<compile_context>
chip_gen: v5e
topology: v5e:2x2
jax: 0.10.0
libtpu: 0.0.40
codegen_flags: <defaults>
</compile_context>

<pallas_src>
import functools

import jax
import jax.numpy as jnp
from jax.experimental import pallas as pl
from jax.experimental.pallas import tpu as pltpu


_TB = 128     # batch (MXU rows) tile
_TF = 512     # contraction (F) tile
_LANE = 128   # lane-width multiple for last dims


def _round_up(x, m):
    return (x + m - 1) // m * m


# ----------------------------- Pallas kernels ------------------------------ #

def _fused_kernel(x_ref, wb_ref, bb_ref, wh_ref, bh_ref,
                  feat_ref, out_ref, acc_ref):
    """grid = (B_tiles, F_tiles); axis 1 is the F reduction.

    x_ref  : [TB, TF]    input chunk
    wb_ref : [TF, Dp]    backbone weight chunk
    bb_ref : [1, Dp]     backbone bias
    wh_ref : [Dp, KHp]   all cluster-head weights (lane-concatenated)
    bh_ref : [1, KHp]    all cluster-head biases
    feat_ref: [TB, Dp]   output: ReLU features
    out_ref : [TB, KHp]  output: all head logits
    acc_ref : [TB, Dp]   f32 accumulator scratch
    """
    k = pl.program_id(1)

    @pl.when(k == 0)
    def _():
        acc_ref[...] = jnp.zeros_like(acc_ref)

    acc_ref[...] += jnp.dot(x_ref[...], wb_ref[...],
                            preferred_element_type=jnp.float32)

    # Bias + ReLU + head matmul only on the last reduction step (epilogue).
    @pl.when(k == pl.num_programs(1) - 1)
    def _():
        feats = jnp.maximum(acc_ref[...] + bb_ref[...], 0.0)
        feat_ref[...] = feats.astype(feat_ref.dtype)
        logits = jnp.dot(feats, wh_ref[...],
                         preferred_element_type=jnp.float32) + bh_ref[...]
        out_ref[...] = logits.astype(out_ref.dtype)


def _heads_kernel(f_ref, wh_ref, bh_ref, o_ref):
    """Heads-only path (forward_pass='head'): one lane-dense matmul per B tile."""
    o_ref[...] = (jnp.dot(f_ref[...], wh_ref[...],
                          preferred_element_type=jnp.float32)
                  + bh_ref[...]).astype(o_ref.dtype)


# ------------------------------ Wrappers ----------------------------------- #

@functools.partial(jax.jit,
                   static_argnames=("backbone_dim", "nheads", "nclusters"))
def _fused_forward(x, w_b_p, b_b_p, w_hc, b_hc, *,
                   backbone_dim, nheads, nclusters):
    """x: [B, C, H, W] (or [B, F]).  Params are pre-padded:
       w_b_p [Fp, Dp], b_b_p [1, Dp], w_hc [Dp, KHp], b_hc [1, KHp]."""
    B = x.shape[0]
    x_flat = x.reshape(B, -1).astype(jnp.float32)
    F = x_flat.shape[1]
    Fp, Dp = w_b_p.shape
    KHp = w_hc.shape[1]
    Bp = _round_up(B, _TB)

    xp = jnp.pad(x_flat, ((0, Bp - B), (0, Fp - F)))

    grid = (Bp // _TB, Fp // _TF)
    feats_p, logits_p = pl.pallas_call(
        _fused_kernel,
        out_shape=(jax.ShapeDtypeStruct((Bp, Dp), jnp.float32),
                   jax.ShapeDtypeStruct((Bp, KHp), jnp.float32)),
        grid_spec=pltpu.PrefetchScalarGridSpec(
            num_scalar_prefetch=0,
            grid=grid,
            in_specs=[
                pl.BlockSpec((_TB, _TF), lambda i, k: (i, k)),
                pl.BlockSpec((_TF, Dp), lambda i, k: (k, 0)),
                pl.BlockSpec((1, Dp), lambda i, k: (0, 0)),
                pl.BlockSpec((Dp, KHp), lambda i, k: (0, 0)),
                pl.BlockSpec((1, KHp), lambda i, k: (0, 0)),
            ],
            out_specs=(pl.BlockSpec((_TB, Dp), lambda i, k: (i, 0)),
                       pl.BlockSpec((_TB, KHp), lambda i, k: (i, 0))),
            scratch_shapes=[pltpu.VMEM((_TB, Dp), jnp.float32)],
        ),
        compiler_params=pltpu.CompilerParams(
            dimension_semantics=("parallel", "arbitrary")),
    )(xp, w_b_p, b_b_p, w_hc, b_hc)

    features = feats_p[:B, :backbone_dim]
    logits = logits_p[:B, :nheads * nclusters].reshape(B, nheads, nclusters)
    per_head = tuple(logits[:, h, :] for h in range(nheads))
    return features, per_head


@functools.partial(jax.jit, static_argnames=("nheads", "nclusters"))
def _heads_forward(features, w_hc, b_hc, *, nheads, nclusters):
    B, D = features.shape
    Dp, KHp = w_hc.shape
    Bp = _round_up(B, _TB)
    fp = jnp.pad(features.astype(jnp.float32), ((0, Bp - B), (0, Dp - D)))

    out_p = pl.pallas_call(
        _heads_kernel,
        out_shape=jax.ShapeDtypeStruct((Bp, KHp), jnp.float32),
        grid_spec=pltpu.PrefetchScalarGridSpec(
            num_scalar_prefetch=0,
            grid=(Bp // _TB,),
            in_specs=[
                pl.BlockSpec((_TB, Dp), lambda i: (i, 0)),
                pl.BlockSpec((Dp, KHp), lambda i: (0, 0)),
                pl.BlockSpec((1, KHp), lambda i: (0, 0)),
            ],
            out_specs=pl.BlockSpec((_TB, KHp), lambda i: (i, 0)),
        ),
        compiler_params=pltpu.CompilerParams(
            dimension_semantics=("parallel",)),
    )(fp, w_hc, b_hc)

    logits = out_p[:B, :nheads * nclusters].reshape(B, nheads, nclusters)
    return tuple(logits[:, h, :] for h in range(nheads))


class ClusteringModelPallas:
    """JAX/Pallas re-implementation of ClusteringModel's forward pass.

    Parameters (unpadded, already in x@W layout):
      backbone_params = (w_b [F, D], b_b [1, D] or [D])
      head_params     = (w_h [nheads, D, K], b_h [nheads, K])
    """

    def __init__(self, backbone_params, head_params, nheads):
        w_b, b_b = backbone_params
        w_h, b_h = head_params
        F, D = w_b.shape
        nh, _, K = w_h.shape
        assert isinstance(nheads, int) and nheads > 0 and nh == nheads

        self.nheads = nheads
        self.nclusters = K
        self.backbone_dim = D

        Fp = _round_up(F, _TF)
        Dp = _round_up(D, _LANE)
        KHp = _round_up(nheads * K, _LANE)

        # One-time host-side zero-padding: padded rows/cols contribute nothing
        # to the matmuls and padded output lanes are sliced off in the wrappers.
        b_b = jnp.asarray(b_b, jnp.float32).reshape(1, D)
        self.w_b_p = jnp.pad(jnp.asarray(w_b, jnp.float32),
                             ((0, Fp - F), (0, Dp - D)))
        self.b_b_p = jnp.pad(b_b, ((0, 0), (0, Dp - D)))

        # All heads collapsed into one lane-dense weight/bias.
        w_hc = jnp.transpose(jnp.asarray(w_h, jnp.float32),
                             (1, 0, 2)).reshape(D, nheads * K)
        b_hc = jnp.asarray(b_h, jnp.float32).reshape(1, nheads * K)
        self.w_hc = jnp.pad(w_hc, ((0, Dp - D), (0, KHp - nheads * K)))
        self.b_hc = jnp.pad(b_hc, ((0, 0), (0, KHp - nheads * K)))

    def _run_fused(self, x):
        return _fused_forward(x, self.w_b_p, self.b_b_p, self.w_hc, self.b_hc,
                              backbone_dim=self.backbone_dim,
                              nheads=self.nheads, nclusters=self.nclusters)

    def forward(self, x, forward_pass="default"):
        if forward_pass == "default":
            _, per_head = self._run_fused(x)
            return list(per_head)
        elif forward_pass == "backbone":
            # Heads logits are computed on resident features (negligible) and
            # simply discarded; features are the requested output.
            features, _ = self._run_fused(x)
            return features
        elif forward_pass == "head":
            per_head = _heads_forward(x, self.w_hc, self.b_hc,
                                      nheads=self.nheads,
                                      nclusters=self.nclusters)
            return list(per_head)
        elif forward_pass == "return_all":
            features, per_head = self._run_fused(x)
            return {"features": features, "output": list(per_head)}
        else:
            raise ValueError("Invalid forward pass {}".format(forward_pass))


# ------------------------------- Main -------------------------------------- #

if __name__ == "__main__":
    # Small shapes consistent with the module.
    B, C, H, W = 2, 4, 16, 16
    backbone_dim = 32
    nclusters = 10
    nheads = 2
    F_in = C * H * W

    key = jax.random.PRNGKey(0)
    kx, kwb, kbb, kwh, kbh = jax.random.split(key, 5)

    x = jax.random.normal(kx, (B, C, H, W), dtype=jnp.float32)

    # Deterministic synthetic parameters (module __init__ defines shapes).
    w_b = jax.random.normal(kwb, (F_in, backbone_dim), dtype=jnp.float32) * 0.02
    b_b = jax.random.normal(kbb, (1, backbone_dim), dtype=jnp.float32) * 0.02
    w_h = jax.random.normal(kwh, (nheads, backbone_dim, nclusters),
                            dtype=jnp.float32) * 0.05
    b_h = jax.random.normal(kbh, (nheads, nclusters), dtype=jnp.float32) * 0.05

    model = ClusteringModelPallas((w_b, b_b), (w_h, b_h), nheads)

    # Run all forward-pass modes.
    out_default = model.forward(x, "default")
    out_backbone = model.forward(x, "backbone")
    out_head = model.forward(out_backbone, "head")
    out_all = model.forward(x, "return_all")

    for o in out_default:
        jax.block_until_ready(o)
    for o in out_head:
        jax.block_until_ready(o)
    jax.block_until_ready(out_backbone)
    jax.block_until_ready(out_all["features"])

    # Reference check against plain-JAX math.
    x_flat = x.reshape(B, -1)
    feats_ref = jnp.maximum(x_flat @ w_b + b_b, 0.0)
    ok = bool(jnp.allclose(out_backbone, feats_ref, atol=1e-4, rtol=1e-4))
    for h in range(nheads):
        logits_ref = feats_ref @ w_h[h] + b_h[h]
        ok = ok and bool(jnp.allclose(out_default[h], logits_ref,
                                      atol=1e-4, rtol=1e-4))
        ok = ok and bool(jnp.allclose(out_head[h], logits_ref,
                                      atol=1e-4, rtol=1e-4))
        ok = ok and bool(jnp.allclose(out_all["output"][h], logits_ref,
                                      atol=1e-4, rtol=1e-4))

    assert ok, "Pallas output mismatch vs. reference"
    print("KERNEL_OK")
</pallas_src>

<mosaic_0001>
module attributes {stable_mosaic.version = 11 : i64} {
  func.func @_fused_kernel(%arg0: i32, %arg1: i32, %arg2: memref<128x512xf32, #tpu.memory_space<vmem>>, %arg3: memref<512x128xf32, #tpu.memory_space<vmem>>, %arg4: memref<1x128xf32, #tpu.memory_space<vmem>>, %arg5: memref<128x128xf32, #tpu.memory_space<vmem>>, %arg6: memref<1x128xf32, #tpu.memory_space<vmem>>, %arg7: memref<128x128xf32, #tpu.memory_space<vmem>>, %arg8: memref<128x128xf32, #tpu.memory_space<vmem>>, %arg9: memref<128x128xf32, #tpu.memory_space<vmem>>) attributes {dimension_semantics = [#tpu.dimension_semantics<parallel>, #tpu.dimension_semantics<arbitrary>], iteration_bounds = array<i64: 1, 2>, scalar_prefetch = 0 : i64, scratch_operands = 1 : i64, tpu.core_type = #tpu.core_type<tc>, window_params = [{transform_indices = @transform_0, window_bounds = array<i64: 128, 512>}, {transform_indices = @transform_1, window_bounds = array<i64: 512, 128>}, {pipeline_mode = #tpu.pipeline_mode<synchronous>, transform_indices = @transform_2, window_bounds = array<i64: 1, 128>}, {pipeline_mode = #tpu.pipeline_mode<synchronous>, transform_indices = @transform_3, window_bounds = array<i64: 128, 128>}, {pipeline_mode = #tpu.pipeline_mode<synchronous>, transform_indices = @transform_4, window_bounds = array<i64: 1, 128>}, {transform_indices = @transform_5, window_bounds = array<i64: 128, 128>}, {transform_indices = @transform_6, window_bounds = array<i64: 128, 128>}]} {
    %c0_i32 = arith.constant 0 : i32
    %0 = arith.cmpi eq, %arg1, %c0_i32 : i32
    %1 = arith.extui %0 : i1 to i32
    %c0_i32_0 = arith.constant 0 : i32
    %2 = arith.cmpi ne, %1, %c0_i32_0 : i32
    scf.if %2 {
      %cst_9 = arith.constant 0.000000e+00 : f32
      %12 = vector.broadcast %cst_9 : f32 to vector<128x128xf32>
      %c0_10 = arith.constant 0 : index
      %c0_11 = arith.constant 0 : index
      %13 = vector.load %arg9[%c0_10, %c0_11] : memref<128x128xf32, #tpu.memory_space<vmem>>, vector<128x128xf32>
      tpu.vector_store %arg9[%c0_10, %c0_11], %12 {strides = array<i32>} : memref<128x128xf32, #tpu.memory_space<vmem>>, vector<128x128xf32>,
    } else {
    }
    %c0 = arith.constant 0 : index
    %c0_1 = arith.constant 0 : index
    %3 = vector.load %arg9[%c0, %c0_1] : memref<128x128xf32, #tpu.memory_space<vmem>>, vector<128x128xf32>
    %c0_2 = arith.constant 0 : index
    %c0_3 = arith.constant 0 : index
    %4 = vector.load %arg2[%c0_2, %c0_3] : memref<128x512xf32, #tpu.memory_space<vmem>>, vector<128x512xf32>
    %c0_4 = arith.constant 0 : index
    %c0_5 = arith.constant 0 : index
    %5 = vector.load %arg3[%c0_4, %c0_5] : memref<512x128xf32, #tpu.memory_space<vmem>>, vector<512x128xf32>
    %cst = arith.constant dense<0.000000e+00> : vector<128x128xf32>
    %6 = tpu.matmul %4, %5, %cst {dimension_numbers = #tpu.dot_dimension_numbers<[1], [0], [0], [1], [0, 0, 1, 1], [], []>} : vector<128x512xf32>, vector<512x128xf32>, vector<128x128xf32> -> vector<128x128xf32>
    %7 = arith.addf %3, %6 : vector<128x128xf32>
    %c0_6 = arith.constant 0 : index
    %c0_7 = arith.constant 0 : index
    %8 = vector.load %arg9[%c0_6, %c0_7] : memref<128x128xf32, #tpu.memory_space<vmem>>, vector<128x128xf32>
    tpu.vector_store %arg9[%c0_6, %c0_7], %7 {strides = array<i32>} : memref<128x128xf32, #tpu.memory_space<vmem>>, vector<128x128xf32>,
    %c1_i32 = arith.constant 1 : i32
    %9 = arith.cmpi eq, %arg1, %c1_i32 : i32
    %10 = arith.extui %9 : i1 to i32
    %c0_i32_8 = arith.constant 0 : i32
    %11 = arith.cmpi ne, %10, %c0_i32_8 : i32
    scf.if %11 {
      %c0_9 = arith.constant 0 : index
      %c0_10 = arith.constant 0 : index
      %12 = vector.load %arg9[%c0_9, %c0_10] : memref<128x128xf32, #tpu.memory_space<vmem>>, vector<128x128xf32>
      %c0_11 = arith.constant 0 : index
      %c0_12 = arith.constant 0 : index
      %13 = vector.load %arg4[%c0_11, %c0_12] : memref<1x128xf32, #tpu.memory_space<vmem>>, vector<1x128xf32>
      %14 = vector.broadcast %13 : vector<1x128xf32> to vector<128x128xf32>
      %15 = arith.addf %12, %14 : vector<128x128xf32>
      %cst_13 = arith.constant 0.000000e+00 : f32
      %16 = vector.broadcast %cst_13 : f32 to vector<128x128xf32>
      %17 = arith.maximumf %15, %16 : vector<128x128xf32>
      %c0_14 = arith.constant 0 : index
      %c0_15 = arith.constant 0 : index
      %18 = vector.load %arg7[%c0_14, %c0_15] : memref<128x128xf32, #tpu.memory_space<vmem>>, vector<128x128xf32>
      tpu.vector_store %arg7[%c0_14, %c0_15], %17 {strides = array<i32>} : memref<128x128xf32, #tpu.memory_space<vmem>>, vector<128x128xf32>,
      %c0_16 = arith.constant 0 : index
      %c0_17 = arith.constant 0 : index
      %19 = vector.load %arg5[%c0_16, %c0_17] : memref<128x128xf32, #tpu.memory_space<vmem>>, vector<128x128xf32>
      %cst_18 = arith.constant dense<0.000000e+00> : vector<128x128xf32>
      %20 = tpu.matmul %17, %19, %cst_18 {dimension_numbers = #tpu.dot_dimension_numbers<[1], [0], [0], [1], [0, 0, 1, 1], [], []>} : vector<128x128xf32>, vector<128x128xf32>, vector<128x128xf32> -> vector<128x128xf32>
      %c0_19 = arith.constant 0 : index
      %c0_20 = arith.constant 0 : index
      %21 = vector.load %arg6[%c0_19, %c0_20] : memref<1x128xf32, #tpu.memory_space<vmem>>, vector<1x128xf32>
      %22 = vector.broadcast %21 : vector<1x128xf32> to vector<128x128xf32>
      %23 = arith.addf %20, %22 : vector<128x128xf32>
      %c0_21 = arith.constant 0 : index
      %c0_22 = arith.constant 0 : index
      %24 = vector.load %arg8[%c0_21, %c0_22] : memref<128x128xf32, #tpu.memory_space<vmem>>, vector<128x128xf32>
      tpu.vector_store %arg8[%c0_21, %c0_22], %23 {strides = array<i32>} : memref<128x128xf32, #tpu.memory_space<vmem>>, vector<128x128xf32>,
    } else {
    }
    return
  }
  func.func @transform_0(%arg0: i32, %arg1: i32) -> (i32, i32) {
    %c0_i32 = arith.constant 0 : i32
    return %arg0, %arg1 : i32, i32
  }
  func.func @transform_1(%arg0: i32, %arg1: i32) -> (i32, i32) {
    %c0_i32 = arith.constant 0 : i32
    %c0_i32_0 = arith.constant 0 : i32
    return %arg1, %c0_i32 : i32, i32
  }
  func.func @transform_2(%arg0: i32, %arg1: i32) -> (i32, i32) {
    %c0_i32 = arith.constant 0 : i32
    %c0_i32_0 = arith.constant 0 : i32
    %c0_i32_1 = arith.constant 0 : i32
    return %c0_i32, %c0_i32_0 : i32, i32
  }
  func.func @transform_3(%arg0: i32, %arg1: i32) -> (i32, i32) {
    %c0_i32 = arith.constant 0 : i32
    %c0_i32_0 = arith.constant 0 : i32
    %c0_i32_1 = arith.constant 0 : i32
    return %c0_i32, %c0_i32_0 : i32, i32
  }
  func.func @transform_4(%arg0: i32, %arg1: i32) -> (i32, i32) {
    %c0_i32 = arith.constant 0 : i32
    %c0_i32_0 = arith.constant 0 : i32
    %c0_i32_1 = arith.constant 0 : i32
    return %c0_i32, %c0_i32_0 : i32, i32
  }
  func.func @transform_5(%arg0: i32, %arg1: i32) -> (i32, i32) {
    %c0_i32 = arith.constant 0 : i32
    %c0_i32_0 = arith.constant 0 : i32
    return %arg0, %c0_i32 : i32, i32
  }
  func.func @transform_6(%arg0: i32, %arg1: i32) -> (i32, i32) {
    %c0_i32 = arith.constant 0 : i32
    %c0_i32_0 = arith.constant 0 : i32
    return %arg0, %c0_i32 : i32, i32
  }
}

</mosaic_0001>

<bundles_post_ra>
// kernel: _fused_forward.1
= control target key start
LH: loop header
LB: loop body
LE: loop exit
PB: predicated region body
PF: predicated region fallthrough
CT: control target
= control target key end

     0   :  { %s1383_s21 = smov 0   ;;  %s1385_s22 = smov 0   ;;  %s1957_s0 = inlined_call_operand.vmem [shape: f32[128,1024], index: 0, kind: input, shape index: {}]   ;;  %s1958_s1 = inlined_call_operand.vmem [shape: f32[1024,128], index: 1, kind: input, shape index: {}]   ;;  %s1959_s2 = inlined_call_operand.vmem [shape: f32[1,128], index: 2, kind: input, shape index: {}]   ;;  %s1960_s3 = inlined_call_operand.vmem [shape: f32[128,128], index: 3, kind: input, shape index: {}]   ;;  %s1961_s4 = inlined_call_operand.vmem [shape: f32[1,128], index: 4, kind: input, shape index: {}]   ;;  %s1962_s5 = inlined_call_operand.vmem [shape: f32[128,128], index: 5, kind: output, shape index: {0}]   ;;  %s1963_s6 = inlined_call_operand.vmem [shape: f32[128,128], index: 6, kind: output, shape index: {1}]  }
   0x1   :  { %s1387_s23 = smov 0   ;;  %s1389_s24 = smov 0  }
   0x2   :  { %s1391_s25 = smov 0  }
   0x3 LB: > { %s26_s26 = sadd.s32 1, %s1341_s24  ;;  %p45_p1 = scmp.ne.s32.totalorder %s1333_s22, %s1329_s21  ;;  %s1345_s25 = sphi %s1391_s25, %s17_s25   ;;  %s1341_s24 = sphi %s1389_s24, %s1967_s24   ;;  %s1337_s23 = sphi %s1387_s23, %s1966_s23   ;;  %s1333_s22 = sphi %s1385_s22, %s1965_s22   ;;  %s1329_s21 = sphi %s1383_s21, %s1964_s21  }
   0x4   : > { %p27_p0 = scmp.ge.s32.totalorder %s26_s26, 2  ;;  %p46_p2 = scmp.eq.s32.totalorder %s1345_s25, 0 }
   0x5   : > { %s38_s28 = sadd.s32 1, %s1333_s22  ;;  %p1199_p5 = scmp.ge.s32.totalorder %s1345_s25, 2 }
   0x6   : > { %s1969_s26 = smov (%p27_p0, %s26_s26), 0  ;;  %p47_p3 = por %p46_p2, %p45_p1 }
   0x7   : > { %s34_s27 = ssub.s32 %s1341_s24, %s1969_s26  ;;  %221 = sbr.rel (%p1199_p5) target bundleno = 80 (0x50), region = 28 }
   0x8   : > { %p36_p4 = scmp.eq.s32.totalorder %s34_s27, 0 }
   0xa   : > { %s1418_s29 = scalar_select %p36_p4, %s1333_s22, %s38_s28  }
   0xc   : > { %224 = sbr.rel (!%p47_p3) target bundleno = 80 (0x50), region = 32  ;;  %s226_s30 = sand.u32 (%p47_p3), 1, %s1333_s22  }
   0xd   : > { %s1215_s7 = sshll.u32 (%p47_p3), %s1341_s24, 5  ;;  %s1200_s8 = sshll.u32 (%p47_p3), %s226_s30, 9 }
   0xe   : > { %s1426_s11 = scalar_lea.vmem (%p47_p3), %s1957_s0, %s1215_s7  ;;  %s1431_s12 = scalar_lea.vmem (%p47_p3), [#allocation3], %s1200_s8 }
   0xf   : > { %v247_v0 = vld [vmem:[%s1426_s11] sm:$0xff] (%p47_p3)  ;;  %v249_v1 = vld [vmem:[%s1426_s11 + $0x8] sm:$0xff] (%p47_p3)  ;;  %v251_v2 = vld [vmem:[%s1426_s11 + $0x10] sm:$0xff] (%p47_p3) }
  0x10   : > { %248 = vst [vmem:[%s1431_s12] sm:$0xff] (%p47_p3), %v247_v0  ;;  %v253_v3 = vld [vmem:[%s1426_s11 + $0x18] sm:$0xff] (%p47_p3)  ;;  %v255_v4 = vld [vmem:[%s1426_s11 + $0x40] sm:$0xff] (%p47_p3)  ;;  %v257_v5 = vld [vmem:[%s1426_s11 + $0x48] sm:$0xff] (%p47_p3) }
  0x11   : > { %250 = vst [vmem:[%s1431_s12 + $0x8] sm:$0xff] %v249_v1  ;;  %v259_v6 = vld [vmem:[%s1426_s11 + $0x50] sm:$0xff]  ;;  %v261_v7 = vld [vmem:[%s1426_s11 + $0x58] sm:$0xff]  ;;  %v263_v8 = vld [vmem:[%s1426_s11 + $0x80] sm:$0xff] }
  0x12   : > { %252 = vst [vmem:[%s1431_s12 + $0x10] sm:$0xff] %v251_v2  ;;  %v265_v9 = vld [vmem:[%s1426_s11 + $0x88] sm:$0xff]  ;;  %v267_v10 = vld [vmem:[%s1426_s11 + $0x90] sm:$0xff]  ;;  %v269_v11 = vld [vmem:[%s1426_s11 + $0x98] sm:$0xff] }
  0x13   : > { %254 = vst [vmem:[%s1431_s12 + $0x18] sm:$0xff] %v253_v3  ;;  %v271_v12 = vld [vmem:[%s1426_s11 + $0xc0] sm:$0xff]  ;;  %v273_v13 = vld [vmem:[%s1426_s11 + $0xc8] sm:$0xff]  ;;  %v275_v14 = vld [vmem:[%s1426_s11 + $0xd0] sm:$0xff] }
  0x14   : > { %256 = vst [vmem:[%s1431_s12 + $0x20] sm:$0xff] %v255_v4  ;;  %v277_v15 = vld [vmem:[%s1426_s11 + $0xd8] sm:$0xff]  ;;  %v279_v16 = vld [vmem:[%s1426_s11 + $0x100] sm:$0xff]  ;;  %v281_v17 = vld [vmem:[%s1426_s11 + $0x108] sm:$0xff] }
  0x15   : > { %258 = vst [vmem:[%s1431_s12 + $0x28] sm:$0xff] %v257_v5  ;;  %v283_v18 = vld [vmem:[%s1426_s11 + $0x110] sm:$0xff]  ;;  %v285_v19 = vld [vmem:[%s1426_s11 + $0x118] sm:$0xff]  ;;  %v287_v20 = vld [vmem:[%s1426_s11 + $0x140] sm:$0xff] }
  0x16   : > { %260 = vst [vmem:[%s1431_s12 + $0x30] sm:$0xff] %v259_v6  ;;  %v289_v21 = vld [vmem:[%s1426_s11 + $0x148] sm:$0xff]  ;;  %v291_v22 = vld [vmem:[%s1426_s11 + $0x150] sm:$0xff]  ;;  %v293_v23 = vld [vmem:[%s1426_s11 + $0x158] sm:$0xff] }
  0x17   : > { %262 = vst [vmem:[%s1431_s12 + $0x38] sm:$0xff] %v261_v7  ;;  %v295_v24 = vld [vmem:[%s1426_s11 + $0x180] sm:$0xff]  ;;  %v297_v25 = vld [vmem:[%s1426_s11 + $0x188] sm:$0xff]  ;;  %v299_v26 = vld [vmem:[%s1426_s11 + $0x190] sm:$0xff] }
  0x18   : > { %264 = vst [vmem:[%s1431_s12 + $0x40] sm:$0xff] %v263_v8  ;;  %v301_v27 = vld [vmem:[%s1426_s11 + $0x198] sm:$0xff]  ;;  %v303_v28 = vld [vmem:[%s1426_s11 + $0x1c0] sm:$0xff]  ;;  %v305_v29 = vld [vmem:[%s1426_s11 + $0x1c8] sm:$0xff] }
  0x19   : > { %266 = vst [vmem:[%s1431_s12 + $0x48] sm:$0xff] %v265_v9  ;;  %v307_v30 = vld [vmem:[%s1426_s11 + $0x1d0] sm:$0xff]  ;;  %v309_v31 = vld [vmem:[%s1426_s11 + $0x1d8] sm:$0xff]  ;;  %v311_v32 = vld [vmem:[%s1426_s11 + $0x200] sm:$0xff] }
  0x1a   : > { %268 = vst [vmem:[%s1431_s12 + $0x50] sm:$0xff] %v267_v10  ;;  %v313_v33 = vld [vmem:[%s1426_s11 + $0x208] sm:$0xff]  ;;  %v315_v34 = vld [vmem:[%s1426_s11 + $0x210] sm:$0xff]  ;;  %v317_v35 = vld [vmem:[%s1426_s11 + $0x218] sm:$0xff] }
  0x1b   : > { %270 = vst [vmem:[%s1431_s12 + $0x58] sm:$0xff] %v269_v11  ;;  %v319_v36 = vld [vmem:[%s1426_s11 + $0x240] sm:$0xff]  ;;  %v321_v37 = vld [vmem:[%s1426_s11 + $0x248] sm:$0xff]  ;;  %v323_v38 = vld [vmem:[%s1426_s11 + $0x250] sm:$0xff] }
  0x1c   : > { %272 = vst [vmem:[%s1431_s12 + $0x60] sm:$0xff] %v271_v12  ;;  %v325_v39 = vld [vmem:[%s1426_s11 + $0x258] sm:$0xff]  ;;  %v327_v40 = vld [vmem:[%s1426_s11 + $0x280] sm:$0xff]  ;;  %v329_v41 = vld [vmem:[%s1426_s11 + $0x288] sm:$0xff] }
  0x1d   : > { %274 = vst [vmem:[%s1431_s12 + $0x68] sm:$0xff] %v273_v13  ;;  %v331_v42 = vld [vmem:[%s1426_s11 + $0x290] sm:$0xff]  ;;  %v333_v43 = vld [vmem:[%s1426_s11 + $0x298] sm:$0xff]  ;;  %v335_v44 = vld [vmem:[%s1426_s11 + $0x2c0] sm:$0xff] }
  0x1e   : > { %276 = vst [vmem:[%s1431_s12 + $0x70] sm:$0xff] %v275_v14  ;;  %v337_v45 = vld [vmem:[%s1426_s11 + $0x2c8] sm:$0xff]  ;;  %v339_v46 = vld [vmem:[%s1426_s11 + $0x2d0] sm:$0xff]  ;;  %v341_v47 = vld [vmem:[%s1426_s11 + $0x2d8] sm:$0xff] }
  0x1f   : > { %278 = vst [vmem:[%s1431_s12 + $0x78] sm:$0xff] %v277_v15  ;;  %v343_v48 = vld [vmem:[%s1426_s11 + $0x300] sm:$0xff]  ;;  %v345_v49 = vld [vmem:[%s1426_s11 + $0x308] sm:$0xff]  ;;  %v347_v50 = vld [vmem:[%s1426_s11 + $0x310] sm:$0xff] }
  0x20   : > { %280 = vst [vmem:[%s1431_s12 + $0x80] sm:$0xff] %v279_v16  ;;  %v349_v51 = vld [vmem:[%s1426_s11 + $0x318] sm:$0xff]  ;;  %v351_v52 = vld [vmem:[%s1426_s11 + $0x340] sm:$0xff]  ;;  %v353_v53 = vld [vmem:[%s1426_s11 + $0x348] sm:$0xff] }
  0x21   : > { %282 = vst [vmem:[%s1431_s12 + $0x88] sm:$0xff] %v281_v17  ;;  %v355_v54 = vld [vmem:[%s1426_s11 + $0x350] sm:$0xff]  ;;  %v357_v55 = vld [vmem:[%s1426_s11 + $0x358] sm:$0xff]  ;;  %v359_v56 = vld [vmem:[%s1426_s11 + $0x380] sm:$0xff] }
  0x22   : > { %284 = vst [vmem:[%s1431_s12 + $0x90] sm:$0xff] %v283_v18  ;;  %v361_v57 = vld [vmem:[%s1426_s11 + $0x388] sm:$0xff]  ;;  %v363_v58 = vld [vmem:[%s1426_s11 + $0x390] sm:$0xff]  ;;  %v365_v59 = vld [vmem:[%s1426_s11 + $0x398] sm:$0xff] }
  0x23   : > { %286 = vst [vmem:[%s1431_s12 + $0x98] sm:$0xff] %v285_v19  ;;  %v367_v60 = vld [vmem:[%s1426_s11 + $0x3c0] sm:$0xff]  ;;  %v369_v61 = vld [vmem:[%s1426_s11 + $0x3c8] sm:$0xff]  ;;  %v371_v62 = vld [vmem:[%s1426_s11 + $0x3d0] sm:$0xff] }
  0x24   : > { %288 = vst [vmem:[%s1431_s12 + $0xa0] sm:$0xff] %v287_v20  ;;  %v373_v63 = vld [vmem:[%s1426_s11 + $0x3d8] sm:$0xff] }
  0x25   : > { %290 = vst [vmem:[%s1431_s12 + $0xa8] sm:$0xff] %v289_v21 }
  0x26   : > { %292 = vst [vmem:[%s1431_s12 + $0xb0] sm:$0xff] %v291_v22 }
  0x27   : > { %294 = vst [vmem:[%s1431_s12 + $0xb8] sm:$0xff] %v293_v23 }
  0x28   : > { %296 = vst [vmem:[%s1431_s12 + $0xc0] sm:$0xff] %v295_v24 }
  0x29   : > { %298 = vst [vmem:[%s1431_s12 + $0xc8] sm:$0xff] %v297_v25 }
  0x2a   : > { %300 = vst [vmem:[%s1431_s12 + $0xd0] sm:$0xff] %v299_v26 }
  0x2b   : > { %302 = vst [vmem:[%s1431_s12 + $0xd8] sm:$0xff] %v301_v27 }
  0x2c   : > { %304 = vst [vmem:[%s1431_s12 + $0xe0] sm:$0xff] %v303_v28 }
  0x2d   : > { %306 = vst [vmem:[%s1431_s12 + $0xe8] sm:$0xff] %v305_v29 }
  0x2e   : > { %308 = vst [vmem:[%s1431_s12 + $0xf0] sm:$0xff] %v307_v30 }
  0x2f   : > { %310 = vst [vmem:[%s1431_s12 + $0xf8] sm:$0xff] %v309_v31 }
  0x30   : > { %312 = vst [vmem:[%s1431_s12 + $0x100] sm:$0xff] %v311_v32 }
  0x31   : > { %314 = vst [vmem:[%s1431_s12 + $0x108] sm:$0xff] %v313_v33 }
  0x32   : > { %316 = vst [vmem:[%s1431_s12 + $0x110] sm:$0xff] %v315_v34 }
  0x33   : > { %318 = vst [vmem:[%s1431_s12 + $0x118] sm:$0xff] %v317_v35 }
  0x34   : > { %320 = vst [vmem:[%s1431_s12 + $0x120] sm:$0xff] %v319_v36 }
  0x35   : > { %322 = vst [vmem:[%s1431_s12 + $0x128] sm:$0xff] %v321_v37 }
  0x36   : > { %324 = vst [vmem:[%s1431_s12 + $0x130] sm:$0xff] %v323_v38 }
  0x37   : > { %326 = vst [vmem:[%s1431_s12 + $0x138] sm:$0xff] %v325_v39 }
  0x38   : > { %328 = vst [vmem:[%s1431_s12 + $0x140] sm:$0xff] %v327_v40 }
  0x39   : > { %330 = vst [vmem:[%s1431_s12 + $0x148] sm:$0xff] %v329_v41 }
  0x3a   : > { %332 = vst [vmem:[%s1431_s12 + $0x150] sm:$0xff] %v331_v42 }
  0x3b   : > { %334 = vst [vmem:[%s1431_s12 + $0x158] sm:$0xff] %v333_v43 }
  0x3c   : > { %336 = vst [vmem:[%s1431_s12 + $0x160] sm:$0xff] %v335_v44 }
  0x3d   : > { %338 = vst [vmem:[%s1431_s12 + $0x168] sm:$0xff] %v337_v45 }
  0x3e   : > { %340 = vst [vmem:[%s1431_s12 + $0x170] sm:$0xff] %v339_v46 }
  0x3f   : > { %342 = vst [vmem:[%s1431_s12 + $0x178] sm:$0xff] %v341_v47 }
  0x40   : > { %344 = vst [vmem:[%s1431_s12 + $0x180] sm:$0xff] %v343_v48 }
  0x41   : > { %346 = vst [vmem:[%s1431_s12 + $0x188] sm:$0xff] %v345_v49 }
  0x42   : > { %348 = vst [vmem:[%s1431_s12 + $0x190] sm:$0xff] %v347_v50 }
  0x43   : > { %350 = vst [vmem:[%s1431_s12 + $0x198] sm:$0xff] %v349_v51 }
  0x44   : > { %352 = vst [vmem:[%s1431_s12 + $0x1a0] sm:$0xff] %v351_v52 }
  0x45   : > { %354 = vst [vmem:[%s1431_s12 + $0x1a8] sm:$0xff] %v353_v53 }
  0x46   : > { %356 = vst [vmem:[%s1431_s12 + $0x1b0] sm:$0xff] %v355_v54 }
  0x47   : > { %358 = vst [vmem:[%s1431_s12 + $0x1b8] sm:$0xff] %v357_v55 }
  0x48   : > { %360 = vst [vmem:[%s1431_s12 + $0x1c0] sm:$0xff] %v359_v56 }
  0x49   : > { %362 = vst [vmem:[%s1431_s12 + $0x1c8] sm:$0xff] %v361_v57 }
  0x4a   : > { %364 = vst [vmem:[%s1431_s12 + $0x1d0] sm:$0xff] %v363_v58 }
  0x4b   : > { %366 = vst [vmem:[%s1431_s12 + $0x1d8] sm:$0xff] %v365_v59 }
  0x4c   : > { %368 = vst [vmem:[%s1431_s12 + $0x1e0] sm:$0xff] %v367_v60 }
  0x4d   : > { %370 = vst [vmem:[%s1431_s12 + $0x1e8] sm:$0xff] %v369_v61 }
  0x4e   : > { %372 = vst [vmem:[%s1431_s12 + $0x1f0] sm:$0xff] %v371_v62 }
  0x4f   : > { %374 = vst [vmem:[%s1431_s12 + $0x1f8] sm:$0xff] %v373_v63 }
  0x50 PF: > { %p1203_p6 = scmp.ge.s32.totalorder %s1345_s25, 1  ;;  %p388_p7 = scmp.lt.s32.totalorder %s1345_s25, 3 }
  0x52   : > { %p389_p8 = pnand %p1203_p6, %p388_p7 }
  0x53   : > { %s395_s13 = sand.u32 (!%p389_p8), 1, %s1329_s21   ;;  %s1205_s14 = sshll.u32 (!%p389_p8), %s1337_s23, 6 }
  0x54   : > { %392 = sbr.rel (%p389_p8) target bundleno = 595 (0x253), region = 59  ;;  %s1204_s15 = sshll.u32 (!%p389_p8), %s395_s13, 9 }
  0x55   : > { %p437_p9 = scmp.lt.s32.totalorder (!%p389_p8), %s1205_s14, 127  ;;  %s1567_s20 = scalar_lea.vmem (!%p389_p8), [#allocation3], %s1204_s15 }
  0x56   : > { %p1207_p10 = scmp.ne.s32.totalorder (!%p389_p8), %s1337_s23, 0 }
  0x59   : > { %s1971_s14 = smov (!%p437_p9, %s1205_s14), 127  ;;  %457 = sbr.rel (%p1207_p10) target bundleno = 111 (0x6f), region = 67 }
  0x5a   : > { %s1206_s16 = sshll.u32 %s1971_s14, 3 }
  0x5b   : > { %s1565_s19 = scalar_lea.vmem %s1958_s1, %s1206_s16 }
  0x5e   : > { %v1347_v0 = vmov 0.0  }
  0x5f   : > { %458 = vst [vmem:[#allocation2 + $0x30] sm:$0xff] %v1347_v0 }
  0x60   : > { %459 = vst [vmem:[#allocation2] sm:$0xff] %v1347_v0 }
  0x61   : > { %460 = vst [vmem:[#allocation2 + $0x58] sm:$0xff] %v1347_v0 }
  0x62   : > { %461 = vst [vmem:[#allocation2 + $0x18] sm:$0xff] %v1347_v0 }
  0x63   : > { %462 = vst [vmem:[#allocation2 + $0x50] sm:$0xff] %v1347_v0 }
  0x64   : > { %463 = vst [vmem:[#allocation2 + $0x68] sm:$0xff] %v1347_v0 }
  0x65   : > { %464 = vst [vmem:[#allocation2 + $0x8] sm:$0xff] %v1347_v0 }
  0x66   : > { %465 = vst [vmem:[#allocation2 + $0x48] sm:$0xff] %v1347_v0 }
  0x67   : > { %466 = vst [vmem:[#allocation2 + $0x40] sm:$0xff] %v1347_v0 }
  0x68   : > { %467 = vst [vmem:[#allocation2 + $0x20] sm:$0xff] %v1347_v0 }
  0x69   : > { %468 = vst [vmem:[#allocation2 + $0x10] sm:$0xff] %v1347_v0 }
  0x6a   : > { %469 = vst [vmem:[#allocation2 + $0x38] sm:$0xff] %v1347_v0 }
  0x6b   : > { %470 = vst [vmem:[#allocation2 + $0x60] sm:$0xff] %v1347_v0 }
  0x6c   : > { %471 = vst [vmem:[#allocation2 + $0x70] sm:$0xff] %v1347_v0 }
  0x6d   : > { %472 = vst [vmem:[#allocation2 + $0x78] sm:$0xff] %v1347_v0 }
  0x6e   : > { %473 = vst [vmem:[#allocation2 + $0x28] sm:$0xff] %v1347_v0 }
  0x6f PF: > { %v601_v1 = vld [vmem:[%s1565_s19 + $0x178] sm:$0xff]  ;;  %v600_v2 = vld [vmem:[%s1565_s19 + $0x170] sm:$0xff]  ;;  %v599_v6 = vld [vmem:[%s1565_s19 + $0x168] sm:$0xff]  ;;  %p1208_p11 = scmp.ne.s32.totalorder %s1337_s23, 1 }
  0x70   : > { %v617_v3 = vld [vmem:[%s1565_s19 + $0x1f8] sm:$0xff]  ;;  %748 = vmatpush.msra.mxu2 %v601_v1  ;;  %v616_v7 = vld [vmem:[%s1565_s19 + $0x1f0] sm:$0xff]  ;;  %v615_v10 = vld [vmem:[%s1565_s19 + $0x1e8] sm:$0xff] }
  0x71   : > { %813 = vmatpush.msra.mxu3 %v617_v3  ;;  %v569_v4 = vld [vmem:[%s1565_s19 + $0x78] sm:$0xff]  ;;  %v568_v8 = vld [vmem:[%s1565_s19 + $0x70] sm:$0xff]  ;;  %v567_v11 = vld [vmem:[%s1565_s19 + $0x68] sm:$0xff] }
  0x72   : > { %v585_v5 = vld [vmem:[%s1565_s19 + $0xf8] sm:$0xff]  ;;  %618 = vmatpush.msra.mxu0 %v569_v4  ;;  %v584_v9 = vld [vmem:[%s1565_s19 + $0xf0] sm:$0xff]  ;;  %749 = vmatpush.msra.mxu2 %v600_v2  ;;  %v598_v12 = vld [vmem:[%s1565_s19 + $0x160] sm:$0xff] }
  0x73   : > { %683 = vmatpush.msra.mxu1 %v585_v5  ;;  %814 = vmatpush.msra.mxu3 %v616_v7  ;;  %v583_v13 = vld [vmem:[%s1565_s19 + $0xe8] sm:$0xff]  ;;  %v614_v14 = vld [vmem:[%s1565_s19 + $0x1e0] sm:$0xff]  ;;  %v597_v17 = vld [vmem:[%s1565_s19 + $0x158] sm:$0xff] }
  0x74   : > { %619 = vmatpush.msra.mxu0 %v568_v8  ;;  %750 = vmatpush.msra.mxu2 %v599_v6  ;;  %v566_v15 = vld [vmem:[%s1565_s19 + $0x60] sm:$0xff]  ;;  %v613_v18 = vld [vmem:[%s1565_s19 + $0x1d8] sm:$0xff]  ;;  %v596_v21 = vld [vmem:[%s1565_s19 + $0x150] sm:$0xff] }
  0x75   : > { %684 = vmatpush.msra.mxu1 %v584_v9  ;;  %815 = vmatpush.msra.mxu3 %v615_v10  ;;  %v582_v16 = vld [vmem:[%s1565_s19 + $0xe0] sm:$0xff]  ;;  %v565_v19 = vld [vmem:[%s1565_s19 + $0x58] sm:$0xff]  ;;  %v612_v22 = vld [vmem:[%s1565_s19 + $0x1d0] sm:$0xff] }
  0x76   : > { %620 = vmatpush.msra.mxu0 %v567_v11  ;;  %751 = vmatpush.msra.mxu2 %v598_v12  ;;  %v581_v20 = vld [vmem:[%s1565_s19 + $0xd8] sm:$0xff]  ;;  %v564_v23 = vld [vmem:[%s1565_s19 + $0x50] sm:$0xff]  ;;  %v595_v25 = vld [vmem:[%s1565_s19 + $0x148] sm:$0xff] }
  0x77   : > { %685 = vmatpush.msra.mxu1 %v583_v13  ;;  %816 = vmatpush.msra.mxu3 %v614_v14  ;;  %v580_v24 = vld [vmem:[%s1565_s19 + $0xd0] sm:$0xff]  ;;  %v611_v26 = vld [vmem:[%s1565_s19 + $0x1c8] sm:$0xff]  ;;  %v594_v29 = vld [vmem:[%s1565_s19 + $0x140] sm:$0xff] }
  0x78   : > { %621 = vmatpush.msra.mxu0 %v566_v15  ;;  %752 = vmatpush.msra.mxu2 %v597_v17  ;;  %v563_v27 = vld [vmem:[%s1565_s19 + $0x48] sm:$0xff]  ;;  %v610_v30 = vld [vmem:[%s1565_s19 + $0x1c0] sm:$0xff]  ;;  %v593_v33 = vld [vmem:[%s1565_s19 + $0x138] sm:$0xff] }
  0x79   : > { %686 = vmatpush.msra.mxu1 %v582_v16  ;;  %817 = vmatpush.msra.mxu3 %v613_v18  ;;  %v579_v28 = vld [vmem:[%s1565_s19 + $0xc8] sm:$0xff]  ;;  %v562_v31 = vld [vmem:[%s1565_s19 + $0x40] sm:$0xff]  ;;  %v609_v34 = vld [vmem:[%s1565_s19 + $0x1b8] sm:$0xff] }
  0x7a   : > { %622 = vmatpush.msra.mxu0 %v565_v19  ;;  %753 = vmatpush.msra.mxu2 %v596_v21  ;;  %v578_v32 = vld [vmem:[%s1565_s19 + $0xc0] sm:$0xff]  ;;  %v561_v35 = vld [vmem:[%s1565_s19 + $0x38] sm:$0xff]  ;;  %v592_v37 = vld [vmem:[%s1565_s19 + $0x130] sm:$0xff] }
  0x7b   : > { %687 = vmatpush.msra.mxu1 %v581_v20  ;;  %818 = vmatpush.msra.mxu3 %v612_v22  ;;  %v577_v36 = vld [vmem:[%s1565_s19 + $0xb8] sm:$0xff]  ;;  %v608_v38 = vld [vmem:[%s1565_s19 + $0x1b0] sm:$0xff]  ;;  %v591_v41 = vld [vmem:[%s1565_s19 + $0x128] sm:$0xff] }
  0x7c   : > { %623 = vmatpush.msra.mxu0 %v564_v23  ;;  %754 = vmatpush.msra.mxu2 %v595_v25  ;;  %v560_v39 = vld [vmem:[%s1565_s19 + $0x30] sm:$0xff]  ;;  %v607_v42 = vld [vmem:[%s1565_s19 + $0x1a8] sm:$0xff]  ;;  %v590_v45 = vld [vmem:[%s1565_s19 + $0x120] sm:$0xff] }
  0x7d   : > { %688 = vmatpush.msra.mxu1 %v580_v24  ;;  %819 = vmatpush.msra.mxu3 %v611_v26  ;;  %v576_v40 = vld [vmem:[%s1565_s19 + $0xb0] sm:$0xff]  ;;  %v559_v43 = vld [vmem:[%s1565_s19 + $0x28] sm:$0xff]  ;;  %v606_v46 = vld [vmem:[%s1565_s19 + $0x1a0] sm:$0xff] }
  0x7e   : > { %624 = vmatpush.msra.mxu0 %v563_v27  ;;  %755 = vmatpush.msra.mxu2 %v594_v29  ;;  %v575_v44 = vld [vmem:[%s1565_s19 + $0xa8] sm:$0xff]  ;;  %v558_v47 = vld [vmem:[%s1565_s19 + $0x20] sm:$0xff]  ;;  %v589_v49 = vld [vmem:[%s1565_s19 + $0x118] sm:$0xff] }
  0x7f   : > { %689 = vmatpush.msra.mxu1 %v579_v28  ;;  %820 = vmatpush.msra.mxu3 %v610_v30  ;;  %v574_v48 = vld [vmem:[%s1565_s19 + $0xa0] sm:$0xff]  ;;  %v605_v50 = vld [vmem:[%s1565_s19 + $0x198] sm:$0xff]  ;;  %v588_v53 = vld [vmem:[%s1565_s19 + $0x110] sm:$0xff] }
  0x80   : > { %625 = vmatpush.msra.mxu0 %v562_v31  ;;  %756 = vmatpush.msra.mxu2 %v593_v33  ;;  %v557_v51 = vld [vmem:[%s1565_s19 + $0x18] sm:$0xff]  ;;  %v604_v54 = vld [vmem:[%s1565_s19 + $0x190] sm:$0xff]  ;;  %v587_v57 = vld [vmem:[%s1565_s19 + $0x108] sm:$0xff] }
  0x81   : > { %690 = vmatpush.msra.mxu1 %v578_v32  ;;  %821 = vmatpush.msra.mxu3 %v609_v34  ;;  %v573_v52 = vld [vmem:[%s1565_s19 + $0x98] sm:$0xff]  ;;  %v556_v55 = vld [vmem:[%s1565_s19 + $0x10] sm:$0xff]  ;;  %v603_v58 = vld [vmem:[%s1565_s19 + $0x188] sm:$0xff] }
  0x82   : > { %626 = vmatpush.msra.mxu0 %v561_v35  ;;  %757 = vmatpush.msra.mxu2 %v592_v37  ;;  %v572_v56 = vld [vmem:[%s1565_s19 + $0x90] sm:$0xff]  ;;  %v555_v59 = vld [vmem:[%s1565_s19 + $0x8] sm:$0xff]  ;;  %v586_v61 = vld [vmem:[%s1565_s19 + $0x100] sm:$0xff] }
  0x83   : > { %691 = vmatpush.msra.mxu1 %v577_v36  ;;  %822 = vmatpush.msra.mxu3 %v608_v38  ;;  %v571_v60 = vld [vmem:[%s1565_s19 + $0x88] sm:$0xff]  ;;  %v602_v62 = vld [vmem:[%s1565_s19 + $0x180] sm:$0xff]  ;;  %v492_v63 = vld [vmem:[%s1567_s20 + $0x10] sm:$0xff] }
  0x84   : > { %627 = vmatpush.msra.mxu0 %v560_v39  ;;  %758 = vmatpush.msra.mxu2 %v591_v41  ;;  %v493_v0 = vld [vmem:[%s1567_s20 + $0x18] sm:$0xff]  ;;  %v554_v1 = vld [vmem:[%s1565_s19] sm:$0xff]  ;;  %v491_v4 = vld [vmem:[%s1567_s20 + $0x8] sm:$0xff] }
  0x85   : > { %692 = vmatpush.msra.mxu1 %v576_v40  ;;  %823 = vmatpush.msra.mxu3 %v607_v42  ;;  %v570_v2 = vld [vmem:[%s1565_s19 + $0x80] sm:$0xff]  ;;  %v496_v5 = vld [vmem:[%s1567_s20 + $0x30] sm:$0xff]  ;;  %v497_v6 = vld [vmem:[%s1567_s20 + $0x38] sm:$0xff] }
  0x86   : > { %628 = vmatpush.msra.mxu0 %v559_v43  ;;  %759 = vmatpush.msra.mxu2 %v590_v45  ;;  %v490_v3 = vld [vmem:[%s1567_s20] sm:$0xff]  ;;  %v495_v8 = vld [vmem:[%s1567_s20 + $0x28] sm:$0xff]  ;;  %v500_v9 = vld [vmem:[%s1567_s20 + $0x50] sm:$0xff] }
  0x87   : > { %693 = vmatpush.msra.mxu1 %v575_v44  ;;  %824 = vmatpush.msra.mxu3 %v606_v46  ;;  %v494_v7 = vld [vmem:[%s1567_s20 + $0x20] sm:$0xff]  ;;  %v501_v10 = vld [vmem:[%s1567_s20 + $0x58] sm:$0xff]  ;;  %v499_v12 = vld [vmem:[%s1567_s20 + $0x48] sm:$0xff] }
  0x88   : > { %629 = vmatpush.msra.mxu0 %v558_v47  ;;  %760 = vmatpush.msra.mxu2 %v589_v49  ;;  %v498_v11 = vld [vmem:[%s1567_s20 + $0x40] sm:$0xff]  ;;  %v504_v13 = vld [vmem:[%s1567_s20 + $0x70] sm:$0xff]  ;;  %v505_v14 = vld [vmem:[%s1567_s20 + $0x78] sm:$0xff] }
  0x89   : > { %694 = vmatpush.msra.mxu1 %v574_v48  ;;  %825 = vmatpush.msra.mxu3 %v605_v50  ;;  %v502_v15 = vld [vmem:[%s1567_s20 + $0x60] sm:$0xff]  ;;  %v503_v16 = vld [vmem:[%s1567_s20 + $0x68] sm:$0xff]  ;;  %v508_v17 = vld [vmem:[%s1567_s20 + $0x90] sm:$0xff] }
  0x8a   : > { %630 = vmatpush.msra.mxu0 %v557_v51  ;;  %761 = vmatpush.msra.mxu2 %v588_v53  ;;  %v509_v18 = vld [vmem:[%s1567_s20 + $0x98] sm:$0xff]  ;;  %v506_v19 = vld [vmem:[%s1567_s20 + $0x80] sm:$0xff]  ;;  %v507_v20 = vld [vmem:[%s1567_s20 + $0x88] sm:$0xff] }
  0x8b   : > { %695 = vmatpush.msra.mxu1 %v573_v52  ;;  %826 = vmatpush.msra.mxu3 %v604_v54  ;;  %v512_v21 = vld [vmem:[%s1567_s20 + $0xb0] sm:$0xff]  ;;  %v513_v22 = vld [vmem:[%s1567_s20 + $0xb8] sm:$0xff]  ;;  %v510_v23 = vld [vmem:[%s1567_s20 + $0xa0] sm:$0xff] }
  0x8c   : > { %631 = vmatpush.msra.mxu0 %v556_v55  ;;  %762 = vmatpush.msra.mxu2 %v587_v57  ;;  %v511_v24 = vld [vmem:[%s1567_s20 + $0xa8] sm:$0xff]  ;;  %v516_v25 = vld [vmem:[%s1567_s20 + $0xd0] sm:$0xff]  ;;  %v517_v26 = vld [vmem:[%s1567_s20 + $0xd8] sm:$0xff] }
  0x8d   : > { %696 = vmatpush.msra.mxu1 %v572_v56  ;;  %827 = vmatpush.msra.mxu3 %v603_v58  ;;  %v514_v27 = vld [vmem:[%s1567_s20 + $0xc0] sm:$0xff]  ;;  %v515_v28 = vld [vmem:[%s1567_s20 + $0xc8] sm:$0xff]  ;;  %v520_v29 = vld [vmem:[%s1567_s20 + $0xf0] sm:$0xff] }
  0x8e   : > { %632 = vmatpush.msra.mxu0 %v555_v59  ;;  %763 = vmatpush.msra.mxu2 %v586_v61  ;;  %v521_v30 = vld [vmem:[%s1567_s20 + $0xf8] sm:$0xff]  ;;  %v518_v31 = vld [vmem:[%s1567_s20 + $0xe0] sm:$0xff]  ;;  %v519_v32 = vld [vmem:[%s1567_s20 + $0xe8] sm:$0xff] }
  0x8f   : > { %697 = vmatpush.msra.mxu1 %v571_v60  ;;  %828 = vmatpush.msra.mxu3 %v602_v62  ;;  %v524_v33 = vld [vmem:[%s1567_s20 + $0x110] sm:$0xff]  ;;  %v525_v34 = vld [vmem:[%s1567_s20 + $0x118] sm:$0xff]  ;;  %v522_v35 = vld [vmem:[%s1567_s20 + $0x100] sm:$0xff] }
  0x90   : > { %764 = vmatmul.f32.vlgmr.msra.gmra.mxu2 %v492_v63  ;;  %829 = vmatmul.f32.vlgmr.msra.gmra.mxu3 %v493_v0  ;;  %v523_v36 = vld [vmem:[%s1567_s20 + $0x108] sm:$0xff]  ;;  %v528_v37 = vld [vmem:[%s1567_s20 + $0x130] sm:$0xff]  ;;  %v529_v38 = vld [vmem:[%s1567_s20 + $0x138] sm:$0xff] }
  0x91   : > { %633 = vmatpush.msra.mxu0 %v554_v1  ;;  %698 = vmatpush.msra.mxu1 %v570_v2  ;;  %v526_v39 = vld [vmem:[%s1567_s20 + $0x120] sm:$0xff]  ;;  %v527_v40 = vld [vmem:[%s1567_s20 + $0x128] sm:$0xff]  ;;  %v532_v41 = vld [vmem:[%s1567_s20 + $0x150] sm:$0xff] }
  0x92   : > { %634 = vmatmul.f32.vlgmr.msra.gmra.mxu0 %v490_v3  ;;  %699 = vmatmul.f32.vlgmr.msra.gmra.mxu1 %v491_v4  ;;  %v533_v42 = vld [vmem:[%s1567_s20 + $0x158] sm:$0xff]  ;;  %v530_v43 = vld [vmem:[%s1567_s20 + $0x140] sm:$0xff]  ;;  %v531_v44 = vld [vmem:[%s1567_s20 + $0x148] sm:$0xff] }
  0x93   : > { %v536_v45 = vld [vmem:[%s1567_s20 + $0x170] sm:$0xff]  ;;  %v537_v46 = vld [vmem:[%s1567_s20 + $0x178] sm:$0xff]  ;;  %v534_v47 = vld [vmem:[%s1567_s20 + $0x160] sm:$0xff] }
  0x94   : > { %v535_v48 = vld [vmem:[%s1567_s20 + $0x168] sm:$0xff]  ;;  %v540_v49 = vld [vmem:[%s1567_s20 + $0x190] sm:$0xff]  ;;  %v541_v50 = vld [vmem:[%s1567_s20 + $0x198] sm:$0xff] }
  0x95   : > { %v538_v51 = vld [vmem:[%s1567_s20 + $0x180] sm:$0xff]  ;;  %v539_v52 = vld [vmem:[%s1567_s20 + $0x188] sm:$0xff]  ;;  %v544_v53 = vld [vmem:[%s1567_s20 + $0x1b0] sm:$0xff] }
  0x96   : > { %v545_v54 = vld [vmem:[%s1567_s20 + $0x1b8] sm:$0xff]  ;;  %v542_v55 = vld [vmem:[%s1567_s20 + $0x1a0] sm:$0xff]  ;;  %v543_v56 = vld [vmem:[%s1567_s20 + $0x1a8] sm:$0xff] }
  0x97   : > { %v548_v57 = vld [vmem:[%s1567_s20 + $0x1d0] sm:$0xff]  ;;  %v549_v58 = vld [vmem:[%s1567_s20 + $0x1d8] sm:$0xff]  ;;  %v546_v59 = vld [vmem:[%s1567_s20 + $0x1c0] sm:$0xff] }
  0x98   : > { %767 = vmatmul.f32.gmra.mxu2 %v496_v5  ;;  %832 = vmatmul.f32.gmra.mxu3 %v497_v6  ;;  %v547_v60 = vld [vmem:[%s1567_s20 + $0x1c8] sm:$0xff]  ;;  %v552_v61 = vld [vmem:[%s1567_s20 + $0x1f0] sm:$0xff]  ;;  %v553_v62 = vld [vmem:[%s1567_s20 + $0x1f8] sm:$0xff] }
  0x99   : > { %v550_v63 = vld [vmem:[%s1567_s20 + $0x1e0] sm:$0xff]  ;;  %v551_v0 = vld [vmem:[%s1567_s20 + $0x1e8] sm:$0xff] }
  0x9a   : > { %637 = vmatmul.f32.gmra.mxu0 %v494_v7  ;;  %702 = vmatmul.f32.gmra.mxu1 %v495_v8  ;;  %v474_v7 = vld [vmem:[#allocation2 + $0x30] sm:$0xff] }
  0xa0   : > { %770 = vmatmul.f32.gmra.mxu2 %v500_v9  ;;  %835 = vmatmul.f32.gmra.mxu3 %v501_v10 }
  0xa2   : > { %640 = vmatmul.f32.gmra.mxu0 %v498_v11  ;;  %705 = vmatmul.f32.gmra.mxu1 %v499_v12 }
  0xa8   : > { %773 = vmatmul.f32.gmra.mxu2 %v504_v13  ;;  %838 = vmatmul.f32.gmra.mxu3 %v505_v14 }
  0xaa   : > { %643 = vmatmul.f32.gmra.mxu0 %v502_v15  ;;  %708 = vmatmul.f32.gmra.mxu1 %v503_v16  ;;  %v475_v16 = vld [vmem:[#allocation2] sm:$0xff] }
  0xb0   : > { %776 = vmatmul.f32.gmra.mxu2 %v508_v17  ;;  %841 = vmatmul.f32.gmra.mxu3 %v509_v18 }
  0xb2   : > { %646 = vmatmul.f32.gmra.mxu0 %v506_v19  ;;  %711 = vmatmul.f32.gmra.mxu1 %v507_v20 }
  0xb8   : > { %779 = vmatmul.f32.gmra.mxu2 %v512_v21  ;;  %844 = vmatmul.f32.gmra.mxu3 %v513_v22 }
  0xba   : > { %649 = vmatmul.f32.gmra.mxu0 %v510_v23  ;;  %714 = vmatmul.f32.gmra.mxu1 %v511_v24 }
  0xc0   : > { %782 = vmatmul.f32.gmra.mxu2 %v516_v25  ;;  %847 = vmatmul.f32.gmra.mxu3 %v517_v26  ;;  %v476_v25 = vld [vmem:[#allocation2 + $0x58] sm:$0xff] }
  0xc2   : > { %652 = vmatmul.f32.gmra.mxu0 %v514_v27  ;;  %717 = vmatmul.f32.gmra.mxu1 %v515_v28 }
  0xc8   : > { %785 = vmatmul.f32.gmra.mxu2 %v520_v29  ;;  %850 = vmatmul.f32.gmra.mxu3 %v521_v30 }
  0xca   : > { %655 = vmatmul.f32.gmra.mxu0 %v518_v31  ;;  %720 = vmatmul.f32.gmra.mxu1 %v519_v32 }
  0xd0   : > { %788 = vmatmul.f32.gmra.mxu2 %v524_v33  ;;  %853 = vmatmul.f32.gmra.mxu3 %v525_v34  ;;  %v477_v34 = vld [vmem:[#allocation2 + $0x18] sm:$0xff] }
  0xd2   : > { %658 = vmatmul.f32.gmra.mxu0 %v522_v35  ;;  %723 = vmatmul.f32.gmra.mxu1 %v523_v36 }
  0xd8   : > { %791 = vmatmul.f32.gmra.mxu2 %v528_v37  ;;  %856 = vmatmul.f32.gmra.mxu3 %v529_v38 }
  0xda   : > { %661 = vmatmul.f32.gmra.mxu0 %v526_v39  ;;  %726 = vmatmul.f32.gmra.mxu1 %v527_v40 }
  0xe0   : > { %794 = vmatmul.f32.gmra.mxu2 %v532_v41  ;;  %859 = vmatmul.f32.gmra.mxu3 %v533_v42 }
  0xe2   : > { %664 = vmatmul.f32.gmra.mxu0 %v530_v43  ;;  %729 = vmatmul.f32.gmra.mxu1 %v531_v44  ;;  %v478_v43 = vld [vmem:[#allocation2 + $0x50] sm:$0xff] }
  0xe8   : > { %797 = vmatmul.f32.gmra.mxu2 %v536_v45  ;;  %862 = vmatmul.f32.gmra.mxu3 %v537_v46 }
  0xea   : > { %667 = vmatmul.f32.gmra.mxu0 %v534_v47  ;;  %732 = vmatmul.f32.gmra.mxu1 %v535_v48 }
  0xf0   : > { %800 = vmatmul.f32.gmra.mxu2 %v540_v49  ;;  %865 = vmatmul.f32.gmra.mxu3 %v541_v50 }
  0xf2   : > { %670 = vmatmul.f32.gmra.mxu0 %v538_v51  ;;  %735 = vmatmul.f32.gmra.mxu1 %v539_v52  ;;  %v479_v52 = vld [vmem:[#allocation2 + $0x68] sm:$0xff] }
  0xf8   : > { %803 = vmatmul.f32.gmra.mxu2 %v544_v53  ;;  %868 = vmatmul.f32.gmra.mxu3 %v545_v54 }
  0xfa   : > { %673 = vmatmul.f32.gmra.mxu0 %v542_v55  ;;  %738 = vmatmul.f32.gmra.mxu1 %v543_v56 }
 0x100   : > { %806 = vmatmul.f32.gmra.mxu2 %v548_v57  ;;  %871 = vmatmul.f32.gmra.mxu3 %v549_v58 }
 0x102   : > { %676 = vmatmul.f32.gmra.mxu0 %v546_v59  ;;  %741 = vmatmul.f32.gmra.mxu1 %v547_v60 }
 0x108   : > { %809 = vmatmul.f32.gmra.mxu2 %v552_v61  ;;  %874 = vmatmul.f32.gmra.mxu3 %v553_v62  ;;  %v480_v61 = vld [vmem:[#allocation2 + $0x8] sm:$0xff] }
 0x10a   : > { %679 = vmatmul.f32.gmra.mxu0 %v550_v63  ;;  %744 = vmatmul.f32.gmra.mxu1 %v551_v0 }
 0x10f   : > { %v635_v1 = vpop.f32.mrf.mxu0  ;;  %v700_v2 = vpop.f32.mrf.mxu1 }
 0x110   : > { %v701_v3 = vadd.f32 %v700_v2, %v635_v1 }
 0x113   : > { %v765_v4 = vpop.f32.mrf.mxu2  ;;  %v830_v5 = vpop.f32.mrf.mxu3 }
 0x114   : > { %v766_v6 = vadd.f32 %v765_v4, %v701_v3 }
 0x116   : > { %v831_v8 = vadd.f32 %v830_v5, %v766_v6  ;;  %v481_v6 = vld [vmem:[#allocation2 + $0x48] sm:$0xff] }
 0x117   : > { %v638_v9 = vpop.f32.mrf.mxu0  ;;  %v703_v10 = vpop.f32.mrf.mxu1 }
 0x118   : > { %v878_v11 = vadd.f32 %v831_v8, %v474_v7  ;;  %v704_v12 = vadd.f32 %v703_v10, %v638_v9 }
 0x11a   : > { %894 = vst [vmem:[#allocation2 + $0x30] sm:$0xff] %v878_v11 }
 0x11b   : > { %v768_v13 = vpop.f32.mrf.mxu2  ;;  %v833_v14 = vpop.f32.mrf.mxu3 }
 0x11c   : > { %v769_v15 = vadd.f32 %v768_v13, %v704_v12 }
 0x11e   : > { %v834_v17 = vadd.f32 %v833_v14, %v769_v15  ;;  %v482_v15 = vld [vmem:[#allocation2 + $0x40] sm:$0xff] }
 0x11f   : > { %v641_v18 = vpop.f32.mrf.mxu0  ;;  %v706_v19 = vpop.f32.mrf.mxu1 }
 0x120   : > { %v879_v20 = vadd.f32 %v834_v17, %v475_v16  ;;  %v707_v21 = vadd.f32 %v706_v19, %v641_v18 }
 0x122   : > { %895 = vst [vmem:[#allocation2] sm:$0xff] %v879_v20 }
 0x123   : > { %v771_v22 = vpop.f32.mrf.mxu2  ;;  %v836_v23 = vpop.f32.mrf.mxu3 }
 0x124   : > { %v772_v24 = vadd.f32 %v771_v22, %v707_v21 }
 0x126   : > { %v837_v26 = vadd.f32 %v836_v23, %v772_v24  ;;  %v483_v24 = vld [vmem:[#allocation2 + $0x20] sm:$0xff] }
 0x127   : > { %v644_v27 = vpop.f32.mrf.mxu0  ;;  %v709_v28 = vpop.f32.mrf.mxu1 }
 0x128   : > { %v880_v29 = vadd.f32 %v837_v26, %v476_v25  ;;  %v710_v30 = vadd.f32 %v709_v28, %v644_v27 }
 0x12a   : > { %896 = vst [vmem:[#allocation2 + $0x58] sm:$0xff] %v880_v29 }
 0x12b   : > { %v774_v31 = vpop.f32.mrf.mxu2  ;;  %v839_v32 = vpop.f32.mrf.mxu3 }
 0x12c   : > { %v775_v33 = vadd.f32 %v774_v31, %v710_v30 }
 0x12e   : > { %v840_v35 = vadd.f32 %v839_v32, %v775_v33  ;;  %v484_v33 = vld [vmem:[#allocation2 + $0x10] sm:$0xff] }
 0x12f   : > { %v647_v36 = vpop.f32.mrf.mxu0  ;;  %v712_v37 = vpop.f32.mrf.mxu1 }
 0x130   : > { %v881_v38 = vadd.f32 %v840_v35, %v477_v34  ;;  %v713_v39 = vadd.f32 %v712_v37, %v647_v36 }
 0x132   : > { %897 = vst [vmem:[#allocation2 + $0x18] sm:$0xff] %v881_v38 }
 0x133   : > { %v777_v40 = vpop.f32.mrf.mxu2  ;;  %v842_v41 = vpop.f32.mrf.mxu3 }
 0x134   : > { %v778_v42 = vadd.f32 %v777_v40, %v713_v39 }
 0x136   : > { %v843_v44 = vadd.f32 %v842_v41, %v778_v42  ;;  %v485_v42 = vld [vmem:[#allocation2 + $0x38] sm:$0xff] }
 0x137   : > { %v650_v45 = vpop.f32.mrf.mxu0  ;;  %v715_v46 = vpop.f32.mrf.mxu1 }
 0x138   : > { %v882_v47 = vadd.f32 %v843_v44, %v478_v43  ;;  %v716_v48 = vadd.f32 %v715_v46, %v650_v45 }
 0x13a   : > { %898 = vst [vmem:[#allocation2 + $0x50] sm:$0xff] %v882_v47 }
 0x13b   : > { %v780_v49 = vpop.f32.mrf.mxu2  ;;  %v845_v50 = vpop.f32.mrf.mxu3 }
 0x13c   : > { %v781_v51 = vadd.f32 %v780_v49, %v716_v48 }
 0x13e   : > { %v846_v53 = vadd.f32 %v845_v50, %v781_v51  ;;  %v486_v51 = vld [vmem:[#allocation2 + $0x60] sm:$0xff] }
 0x13f   : > { %v653_v54 = vpop.f32.mrf.mxu0  ;;  %v718_v55 = vpop.f32.mrf.mxu1 }
 0x140   : > { %v883_v56 = vadd.f32 %v846_v53, %v479_v52  ;;  %v719_v57 = vadd.f32 %v718_v55, %v653_v54 }
 0x142   : > { %899 = vst [vmem:[#allocation2 + $0x68] sm:$0xff] %v883_v56 }
 0x143   : > { %v783_v58 = vpop.f32.mrf.mxu2  ;;  %v848_v59 = vpop.f32.mrf.mxu3 }
 0x144   : > { %v784_v60 = vadd.f32 %v783_v58, %v719_v57 }
 0x146   : > { %v849_v62 = vadd.f32 %v848_v59, %v784_v60  ;;  %v487_v60 = vld [vmem:[#allocation2 + $0x70] sm:$0xff] }
 0x147   : > { %v656_v63 = vpop.f32.mrf.mxu0  ;;  %v721_v0 = vpop.f32.mrf.mxu1 }
 0x148   : > { %v884_v1 = vadd.f32 %v849_v62, %v480_v61  ;;  %v722_v2 = vadd.f32 %v721_v0, %v656_v63 }
 0x14a   : > { %900 = vst [vmem:[#allocation2 + $0x8] sm:$0xff] %v884_v1 }
 0x14b   : > { %v786_v3 = vpop.f32.mrf.mxu2  ;;  %v851_v4 = vpop.f32.mrf.mxu3 }
 0x14c   : > { %v787_v5 = vadd.f32 %v786_v3, %v722_v2 }
 0x14e   : > { %v852_v7 = vadd.f32 %v851_v4, %v787_v5  ;;  %v488_v5 = vld [vmem:[#allocation2 + $0x78] sm:$0xff] }
 0x14f   : > { %v659_v8 = vpop.f32.mrf.mxu0  ;;  %v724_v9 = vpop.f32.mrf.mxu1 }
 0x150   : > { %v885_v10 = vadd.f32 %v852_v7, %v481_v6  ;;  %v725_v11 = vadd.f32 %v724_v9, %v659_v8 }
 0x152   : > { %901 = vst [vmem:[#allocation2 + $0x48] sm:$0xff] %v885_v10 }
 0x153   : > { %v789_v12 = vpop.f32.mrf.mxu2  ;;  %v854_v13 = vpop.f32.mrf.mxu3 }
 0x154   : > { %v790_v14 = vadd.f32 %v789_v12, %v725_v11 }
 0x156   : > { %v855_v16 = vadd.f32 %v854_v13, %v790_v14  ;;  %v489_v14 = vld [vmem:[#allocation2 + $0x28] sm:$0xff] }
 0x157   : > { %v662_v17 = vpop.f32.mrf.mxu0  ;;  %v727_v18 = vpop.f32.mrf.mxu1 }
 0x158   : > { %v886_v19 = vadd.f32 %v855_v16, %v482_v15  ;;  %v728_v20 = vadd.f32 %v727_v18, %v662_v17 }
 0x15a   : > { %902 = vst [vmem:[#allocation2 + $0x40] sm:$0xff] %v886_v19 }
 0x15b   : > { %v792_v21 = vpop.f32.mrf.mxu2  ;;  %v857_v22 = vpop.f32.mrf.mxu3 }
 0x15c   : > { %v793_v23 = vadd.f32 %v792_v21, %v728_v20 }
 0x15e   : > { %v858_v25 = vadd.f32 %v857_v22, %v793_v23 }
 0x15f   : > { %v665_v26 = vpop.f32.mrf.mxu0  ;;  %v730_v27 = vpop.f32.mrf.mxu1 }
 0x160   : > { %v887_v28 = vadd.f32 %v858_v25, %v483_v24  ;;  %v731_v29 = vadd.f32 %v730_v27, %v665_v26 }
 0x162   : > { %903 = vst [vmem:[#allocation2 + $0x20] sm:$0xff] %v887_v28 }
 0x163   : > { %v795_v30 = vpop.f32.mrf.mxu2  ;;  %v860_v31 = vpop.f32.mrf.mxu3 }
 0x164   : > { %v796_v32 = vadd.f32 %v795_v30, %v731_v29 }
 0x166   : > { %v861_v34 = vadd.f32 %v860_v31, %v796_v32 }
 0x167   : > { %v668_v35 = vpop.f32.mrf.mxu0  ;;  %v733_v36 = vpop.f32.mrf.mxu1 }
 0x168   : > { %v888_v37 = vadd.f32 %v861_v34, %v484_v33  ;;  %v734_v38 = vadd.f32 %v733_v36, %v668_v35 }
 0x16a   : > { %904 = vst [vmem:[#allocation2 + $0x10] sm:$0xff] %v888_v37 }
 0x16b   : > { %v798_v39 = vpop.f32.mrf.mxu2  ;;  %v863_v40 = vpop.f32.mrf.mxu3 }
 0x16c   : > { %v799_v41 = vadd.f32 %v798_v39, %v734_v38 }
 0x16e   : > { %v864_v43 = vadd.f32 %v863_v40, %v799_v41 }
 0x16f   : > { %v671_v44 = vpop.f32.mrf.mxu0  ;;  %v736_v45 = vpop.f32.mrf.mxu1 }
 0x170   : > { %v889_v46 = vadd.f32 %v864_v43, %v485_v42  ;;  %v737_v47 = vadd.f32 %v736_v45, %v671_v44 }
 0x172   : > { %905 = vst [vmem:[#allocation2 + $0x38] sm:$0xff] %v889_v46 }
 0x173   : > { %v801_v48 = vpop.f32.mrf.mxu2  ;;  %v866_v49 = vpop.f32.mrf.mxu3 }
 0x174   : > { %v802_v50 = vadd.f32 %v801_v48, %v737_v47 }
 0x176   : > { %v867_v52 = vadd.f32 %v866_v49, %v802_v50 }
 0x177   : > { %v674_v53 = vpop.f32.mrf.mxu0  ;;  %v739_v54 = vpop.f32.mrf.mxu1 }
 0x178   : > { %v890_v55 = vadd.f32 %v867_v52, %v486_v51  ;;  %v740_v56 = vadd.f32 %v739_v54, %v674_v53 }
 0x17a   : > { %906 = vst [vmem:[#allocation2 + $0x60] sm:$0xff] %v890_v55 }
 0x17b   : > { %v804_v57 = vpop.f32.mrf.mxu2  ;;  %v869_v58 = vpop.f32.mrf.mxu3 }
 0x17c   : > { %v805_v59 = vadd.f32 %v804_v57, %v740_v56 }
 0x17e   : > { %v870_v61 = vadd.f32 %v869_v58, %v805_v59 }
 0x17f   : > { %v677_v62 = vpop.f32.mrf.mxu0  ;;  %v742_v63 = vpop.f32.mrf.mxu1 }
 0x180   : > { %v891_v0 = vadd.f32 %v870_v61, %v487_v60  ;;  %v743_v1 = vadd.f32 %v742_v63, %v677_v62 }
 0x182   : > { %907 = vst [vmem:[#allocation2 + $0x70] sm:$0xff] %v891_v0 }
 0x183   : > { %v807_v2 = vpop.f32.mrf.mxu2  ;;  %v872_v3 = vpop.f32.mrf.mxu3 }
 0x184   : > { %v808_v4 = vadd.f32 %v807_v2, %v743_v1 }
 0x186   : > { %v873_v6 = vadd.f32 %v872_v3, %v808_v4 }
 0x187   : > { %v680_v7 = vpop.f32.mrf.mxu0  ;;  %v745_v8 = vpop.f32.mrf.mxu1 }
 0x188   : > { %v892_v9 = vadd.f32 %v873_v6, %v488_v5  ;;  %v746_v10 = vadd.f32 %v745_v8, %v680_v7 }
 0x18a   : > { %908 = vst [vmem:[#allocation2 + $0x78] sm:$0xff] %v892_v9 }
 0x18b   : > { %v810_v11 = vpop.f32.mrf.mxu2  ;;  %v875_v12 = vpop.f32.mrf.mxu3 }
 0x18c   : > { %v811_v13 = vadd.f32 %v810_v11, %v746_v10 }
 0x18e   : > { %v876_v15 = vadd.f32 %v875_v12, %v811_v13  ;;  %913 = sbr.rel (%p1208_p11) target bundleno = 595 (0x253), region = 71 }
 0x190   : > { %v893_v16 = vadd.f32 %v876_v15, %v489_v14 }
 0x192   : > { %909 = vst [vmem:[#allocation2 + $0x28] sm:$0xff] %v893_v16 }
 0x193   : > { %v997_v17 = vld [vmem:[%s1960_s3 + $0x78] sm:$0xff]  ;;  %v996_v18 = vld [vmem:[%s1960_s3 + $0x70] sm:$0xff]  ;;  %v995_v19 = vld [vmem:[%s1960_s3 + $0x68] sm:$0xff] }
 0x194   : > { %1217 = vmatpush.msra.mxu2 %v997_v17  ;;  %1218 = vmatpush.msra.mxu3 %v997_v17  ;;  %v994_v20 = vld [vmem:[%s1960_s3 + $0x60] sm:$0xff]  ;;  %v993_v21 = vld [vmem:[%s1960_s3 + $0x58] sm:$0xff]  ;;  %v914_v25 = vld [vmem:[#allocation2 + $0x30] sm:$0xff] }
 0x195   : > { %1002 = vmatpush.msra.mxu0 %v997_v17  ;;  %1216 = vmatpush.msra.mxu1 %v997_v17  ;;  %v922_v22 = vld [vmem:[#allocation2 + $0x40] sm:$0xff]  ;;  %v918_v26 = vld [vmem:[#allocation2 + $0x50] sm:$0xff]  ;;  %v991_v35 = vld [vmem:[%s1960_s3 + $0x48] sm:$0xff] }
 0x196   : > { %1220 = vmatpush.msra.mxu2 %v996_v18  ;;  %1221 = vmatpush.msra.mxu3 %v996_v18  ;;  %v1717_v23 = vld [vmem:[%s1959_s2] ss:$0 sm:$0xff]  ;;  %v992_v28 = vld [vmem:[%s1960_s3 + $0x50] sm:$0xff]  ;;  %v919_v38 = vld [vmem:[#allocation2 + $0x68] sm:$0xff] }
 0x197   : > { %1003 = vmatpush.msra.mxu0 %v996_v18  ;;  %1219 = vmatpush.msra.mxu1 %v996_v18  ;;  %v926_v24 = vld [vmem:[#allocation2 + $0x60] sm:$0xff]  ;;  %v1723_v29 = vadd.f32 %v1717_v23, %v922_v22  ;;  %v1729_v31 = vadd.f32 %v1717_v23, %v914_v25  ;;  %v927_v32 = vld [vmem:[#allocation2 + $0x70] sm:$0xff]  ;;  %v1732_v33 = vadd.f32 %v1717_v23, %v918_v26  ;;  %v928_v45 = vld [vmem:[#allocation2 + $0x78] sm:$0xff] }
 0x198   : > { %1223 = vmatpush.msra.mxu2 %v995_v19  ;;  %1224 = vmatpush.msra.mxu3 %v995_v19  ;;  %v923_v27 = vld [vmem:[#allocation2 + $0x20] sm:$0xff]  ;;  %v1726_v30 = vadd.f32 %v1717_v23, %v926_v24  ;;  %v1743_v40 = vadd.f32 %v1717_v23, %v927_v32  ;;  %v924_v41 = vld [vmem:[#allocation2 + $0x10] sm:$0xff]  ;;  %v1764_v47 = vadd.f32 %v1717_v23, %v919_v38  ;;  %v989_v48 = vld [vmem:[%s1960_s3 + $0x38] sm:$0xff] }
 0x199   : > { %1004 = vmatpush.msra.mxu0 %v995_v19  ;;  %1222 = vmatpush.msra.mxu1 %v995_v19  ;;  %v915_v34 = vld [vmem:[#allocation2] sm:$0xff]  ;;  %v958_v36 = vmax.f32 %v1723_v29, 0.0  ;;  %v1739_v37 = vadd.f32 %v1717_v23, %v923_v27  ;;  %v950_v43 = vmax.f32 %v1729_v31, 0.0  ;;  %v954_v46 = vmax.f32 %v1732_v33, 0.0  ;;  %v988_v53 = vld [vmem:[%s1960_s3 + $0x30] sm:$0xff]  ;;  %v916_v55 = vld [vmem:[#allocation2 + $0x58] sm:$0xff] }
 0x19a   : > { %1226 = vmatpush.msra.mxu2 %v994_v20  ;;  %1227 = vmatpush.msra.mxu3 %v994_v20  ;;  %v962_v39 = vmax.f32 %v1726_v30, 0.0  ;;  %v990_v42 = vld [vmem:[%s1960_s3 + $0x40] sm:$0xff]  ;;  %v1755_v44 = vadd.f32 %v1717_v23, %v915_v34  ;;  %v1776_v50 = vadd.f32 %v1717_v23, %v924_v41  ;;  %v963_v51 = vmax.f32 %v1743_v40, 0.0  ;;  %v920_v58 = vld [vmem:[#allocation2 + $0x8] sm:$0xff]  ;;  %v925_v62 = vld [vmem:[#allocation2 + $0x38] sm:$0xff] }
 0x19b   : > { %1005 = vmatpush.msra.mxu0 %v994_v20  ;;  %1225 = vmatpush.msra.mxu1 %v994_v20  ;;  %974 = vst [vmem:[%s1962_s5 + $0x40] sm:$0xff] %v958_v36  ;;  %v959_v49 = vmax.f32 %v1739_v37, 0.0  ;;  %v1785_v52 = vadd.f32 %v1717_v23, %v928_v45  ;;  %v955_v56 = vmax.f32 %v1764_v47, 0.0  ;;  %v1803_v57 = vadd.f32 %v1717_v23, %v916_v55  ;;  %v987_v59 = vld [vmem:[%s1960_s3 + $0x28] sm:$0xff]  ;;  %v986_v2 = vld [vmem:[%s1960_s3 + $0x20] sm:$0xff]  ;;  %v985_v6 = vld [vmem:[%s1960_s3 + $0x18] sm:$0xff] }
 0x19c   : > { %1229 = vmatpush.msra.mxu2 %v993_v21  ;;  %1230 = vmatpush.msra.mxu3 %v993_v21  ;;  %978 = vst [vmem:[%s1962_s5 + $0x60] sm:$0xff] %v962_v39  ;;  %v951_v54 = vmax.f32 %v1755_v44, 0.0  ;;  %v960_v60 = vmax.f32 %v1776_v50, 0.0  ;;  %v1815_v61 = vadd.f32 %v1717_v23, %v920_v58  ;;  %v1824_v0 = vadd.f32 %v1717_v23, %v925_v62  ;;  %v929_v1 = vld [vmem:[#allocation2 + $0x28] sm:$0xff]  ;;  %v984_v9 = vld [vmem:[%s1960_s3 + $0x10] sm:$0xff]  ;;  %v917_v10 = vld [vmem:[#allocation2 + $0x18] sm:$0xff] }
 0x19d   : > { %1006 = vmatpush.msra.mxu0 %v993_v21  ;;  %1228 = vmatpush.msra.mxu1 %v993_v21  ;;  %966 = vst [vmem:[%s1962_s5] sm:$0xff] %v950_v43  ;;  %v964_v63 = vmax.f32 %v1785_v52, 0.0  ;;  %v952_v3 = vmax.f32 %v1803_v57, 0.0  ;;  %v949_v4 = vadd.f32 %v1717_v23, %v929_v1  ;;  %v937_v11 = vadd.f32 %v1717_v23, %v917_v10  ;;  %v921_v12 = vld [vmem:[#allocation2 + $0x48] sm:$0xff]  ;;  %v982_v16 = vld [vmem:[%s1960_s3] sm:$0xff] }
 0x19e   : > { %1232 = vmatpush.msra.mxu2 %v992_v28  ;;  %1233 = vmatpush.msra.mxu3 %v992_v28  ;;  %970 = vst [vmem:[%s1962_s5 + $0x20] sm:$0xff] %v954_v46  ;;  %v956_v5 = vmax.f32 %v1815_v61, 0.0  ;;  %v961_v7 = vmax.f32 %v1824_v0, 0.0  ;;  %v983_v13 = vld [vmem:[%s1960_s3 + $0x8] sm:$0xff]  ;;  %v941_v14 = vadd.f32 %v1717_v23, %v921_v12  ;;  %v1306_v18 = vld [vmem:[%s1961_s4] ss:$0 sm:$0xff] }
 0x19f   : > { %1007 = vmatpush.msra.mxu0 %v992_v28  ;;  %1231 = vmatpush.msra.mxu1 %v992_v28  ;;  %975 = vst [vmem:[%s1962_s5 + $0x48] sm:$0xff] %v959_v49  ;;  %v965_v8 = vmax.f32 %v949_v4, 0.0  ;;  %v953_v15 = vmax.f32 %v937_v11, 0.0 }
 0x1a0   : > { %1235 = vmatpush.msra.mxu2 %v991_v35  ;;  %1236 = vmatpush.msra.mxu3 %v991_v35  ;;  %979 = vst [vmem:[%s1962_s5 + $0x68] sm:$0xff] %v963_v51  ;;  %v957_v17 = vmax.f32 %v941_v14, 0.0 }
 0x1a1   : > { %1008 = vmatpush.msra.mxu0 %v991_v35  ;;  %1234 = vmatpush.msra.mxu1 %v991_v35  ;;  %967 = vst [vmem:[%s1962_s5 + $0x8] sm:$0xff] %v951_v54 }
 0x1a2   : > { %1238 = vmatpush.msra.mxu2 %v990_v42  ;;  %1239 = vmatpush.msra.mxu3 %v990_v42  ;;  %971 = vst [vmem:[%s1962_s5 + $0x28] sm:$0xff] %v955_v56 }
 0x1a3   : > { %1009 = vmatpush.msra.mxu0 %v990_v42  ;;  %1237 = vmatpush.msra.mxu1 %v990_v42  ;;  %976 = vst [vmem:[%s1962_s5 + $0x50] sm:$0xff] %v960_v60 }
 0x1a4   : > { %1241 = vmatpush.msra.mxu2 %v989_v48  ;;  %1242 = vmatpush.msra.mxu3 %v989_v48  ;;  %980 = vst [vmem:[%s1962_s5 + $0x70] sm:$0xff] %v964_v63 }
 0x1a5   : > { %1010 = vmatpush.msra.mxu0 %v989_v48  ;;  %1240 = vmatpush.msra.mxu1 %v989_v48  ;;  %968 = vst [vmem:[%s1962_s5 + $0x10] sm:$0xff] %v952_v3 }
 0x1a6   : > { %1244 = vmatpush.msra.mxu2 %v988_v53  ;;  %1245 = vmatpush.msra.mxu3 %v988_v53  ;;  %972 = vst [vmem:[%s1962_s5 + $0x30] sm:$0xff] %v956_v5 }
 0x1a7   : > { %1011 = vmatpush.msra.mxu0 %v988_v53  ;;  %1243 = vmatpush.msra.mxu1 %v988_v53  ;;  %977 = vst [vmem:[%s1962_s5 + $0x58] sm:$0xff] %v961_v7 }
 0x1a8   : > { %1247 = vmatpush.msra.mxu2 %v987_v59  ;;  %1248 = vmatpush.msra.mxu3 %v987_v59  ;;  %981 = vst [vmem:[%s1962_s5 + $0x78] sm:$0xff] %v965_v8 }
 0x1a9   : > { %1012 = vmatpush.msra.mxu0 %v987_v59  ;;  %1246 = vmatpush.msra.mxu1 %v987_v59  ;;  %969 = vst [vmem:[%s1962_s5 + $0x18] sm:$0xff] %v953_v15 }
 0x1aa   : > { %1250 = vmatpush.msra.mxu2 %v986_v2  ;;  %1251 = vmatpush.msra.mxu3 %v986_v2  ;;  %973 = vst [vmem:[%s1962_s5 + $0x38] sm:$0xff] %v957_v17 }
 0x1ab   : > { %1013 = vmatpush.msra.mxu0 %v986_v2  ;;  %1249 = vmatpush.msra.mxu1 %v986_v2 }
 0x1ac   : > { %1253 = vmatpush.msra.mxu2 %v985_v6  ;;  %1254 = vmatpush.msra.mxu3 %v985_v6 }
 0x1ad   : > { %1014 = vmatpush.msra.mxu0 %v985_v6  ;;  %1252 = vmatpush.msra.mxu1 %v985_v6 }
 0x1ae   : > { %1256 = vmatpush.msra.mxu2 %v984_v9  ;;  %1257 = vmatpush.msra.mxu3 %v984_v9 }
 0x1af   : > { %1015 = vmatpush.msra.mxu0 %v984_v9  ;;  %1255 = vmatpush.msra.mxu1 %v984_v9 }
 0x1b0   : > { %1259 = vmatpush.msra.mxu2 %v983_v13  ;;  %1260 = vmatpush.msra.mxu3 %v983_v13 }
 0x1b1   : > { %1016 = vmatpush.msra.mxu0 %v983_v13  ;;  %1258 = vmatpush.msra.mxu1 %v983_v13 }
 0x1b2   : > { %1262 = vmatpush.msra.mxu2 %v982_v16  ;;  %1263 = vmatpush.msra.mxu3 %v982_v16 }
 0x1b3   : > { %1042 = vmatmul.f32.vlgmr.msra.gmra.mxu2 %v958_v36  ;;  %1054 = vmatmul.f32.vlgmr.msra.gmra.mxu3 %v962_v39 }
 0x1b4   : > { %1017 = vmatpush.msra.mxu0 %v982_v16  ;;  %1261 = vmatpush.msra.mxu1 %v982_v16 }
 0x1b5   : > { %1018 = vmatmul.f32.vlgmr.msra.gmra.mxu0 %v950_v43  ;;  %1030 = vmatmul.f32.vlgmr.msra.gmra.mxu1 %v954_v46 }
 0x1bb   : > { %1045 = vmatmul.f32.gmra.mxu2 %v959_v49  ;;  %1057 = vmatmul.f32.gmra.mxu3 %v963_v51 }
 0x1bd   : > { %1021 = vmatmul.f32.gmra.mxu0 %v951_v54  ;;  %1033 = vmatmul.f32.gmra.mxu1 %v955_v56 }
 0x1c3   : > { %1048 = vmatmul.f32.gmra.mxu2 %v960_v60  ;;  %1060 = vmatmul.f32.gmra.mxu3 %v964_v63 }
 0x1c5   : > { %1024 = vmatmul.f32.gmra.mxu0 %v952_v3  ;;  %1036 = vmatmul.f32.gmra.mxu1 %v956_v5 }
 0x1cb   : > { %1051 = vmatmul.f32.gmra.mxu2 %v961_v7  ;;  %1063 = vmatmul.f32.gmra.mxu3 %v965_v8 }
 0x1cd   : > { %1027 = vmatmul.f32.gmra.mxu0 %v953_v15  ;;  %1039 = vmatmul.f32.gmra.mxu1 %v957_v17 }
 0x232   : > { %v1019_v19 = vpop.f32.mrf.mxu0  ;;  %v1031_v20 = vpop.f32.mrf.mxu1 }
 0x233   : > { %v1020_v21 = vadd.f32 %v1306_v18, %v1019_v19  ;;  %v1032_v22 = vadd.f32 %v1306_v18, %v1031_v20 }
 0x235   : > { %1067 = vst [vmem:[%s1963_s6] sm:$0xff] %v1020_v21 }
 0x236   : > { %1071 = vst [vmem:[%s1963_s6 + $0x20] sm:$0xff] %v1032_v22  ;;  %v1043_v23 = vpop.f32.mrf.mxu2  ;;  %v1055_v24 = vpop.f32.mrf.mxu3 }
 0x237   : > { %v1044_v25 = vadd.f32 %v1306_v18, %v1043_v23  ;;  %v1056_v26 = vadd.f32 %v1306_v18, %v1055_v24 }
 0x239   : > { %1075 = vst [vmem:[%s1963_s6 + $0x40] sm:$0xff] %v1044_v25 }
 0x23a   : > { %1079 = vst [vmem:[%s1963_s6 + $0x60] sm:$0xff] %v1056_v26  ;;  %v1022_v27 = vpop.f32.mrf.mxu0  ;;  %v1034_v28 = vpop.f32.mrf.mxu1 }
 0x23b   : > { %v1023_v29 = vadd.f32 %v1306_v18, %v1022_v27  ;;  %v1035_v30 = vadd.f32 %v1306_v18, %v1034_v28 }
 0x23d   : > { %1068 = vst [vmem:[%s1963_s6 + $0x8] sm:$0xff] %v1023_v29 }
 0x23e   : > { %1072 = vst [vmem:[%s1963_s6 + $0x28] sm:$0xff] %v1035_v30  ;;  %v1046_v31 = vpop.f32.mrf.mxu2  ;;  %v1058_v32 = vpop.f32.mrf.mxu3 }
 0x23f   : > { %v1047_v33 = vadd.f32 %v1306_v18, %v1046_v31  ;;  %v1059_v34 = vadd.f32 %v1306_v18, %v1058_v32 }
 0x241   : > { %1076 = vst [vmem:[%s1963_s6 + $0x48] sm:$0xff] %v1047_v33 }
 0x242   : > { %1080 = vst [vmem:[%s1963_s6 + $0x68] sm:$0xff] %v1059_v34  ;;  %v1025_v35 = vpop.f32.mrf.mxu0  ;;  %v1037_v36 = vpop.f32.mrf.mxu1 }
 0x243   : > { %v1026_v37 = vadd.f32 %v1306_v18, %v1025_v35  ;;  %v1038_v38 = vadd.f32 %v1306_v18, %v1037_v36 }
 0x245   : > { %1069 = vst [vmem:[%s1963_s6 + $0x10] sm:$0xff] %v1026_v37 }
 0x246   : > { %1073 = vst [vmem:[%s1963_s6 + $0x30] sm:$0xff] %v1038_v38  ;;  %v1049_v39 = vpop.f32.mrf.mxu2  ;;  %v1061_v40 = vpop.f32.mrf.mxu3 }
 0x247   : > { %v1050_v41 = vadd.f32 %v1306_v18, %v1049_v39  ;;  %v1062_v42 = vadd.f32 %v1306_v18, %v1061_v40 }
 0x249   : > { %1077 = vst [vmem:[%s1963_s6 + $0x50] sm:$0xff] %v1050_v41 }
 0x24a   : > { %1081 = vst [vmem:[%s1963_s6 + $0x70] sm:$0xff] %v1062_v42  ;;  %v1028_v43 = vpop.f32.mrf.mxu0  ;;  %v1040_v44 = vpop.f32.mrf.mxu1 }
 0x24b   : > { %v1029_v45 = vadd.f32 %v1306_v18, %v1028_v43  ;;  %v1041_v46 = vadd.f32 %v1306_v18, %v1040_v44 }
 0x24d   : > { %1070 = vst [vmem:[%s1963_s6 + $0x18] sm:$0xff] %v1029_v45 }
 0x24e   : > { %1074 = vst [vmem:[%s1963_s6 + $0x38] sm:$0xff] %v1041_v46  ;;  %v1052_v47 = vpop.f32.mrf.mxu2  ;;  %v1064_v48 = vpop.f32.mrf.mxu3 }
 0x24f   : > { %v1053_v49 = vadd.f32 %v1306_v18, %v1052_v47  ;;  %v1065_v50 = vadd.f32 %v1306_v18, %v1064_v48 }
 0x251   : > { %1078 = vst [vmem:[%s1963_s6 + $0x58] sm:$0xff] %v1053_v49 }
 0x252   : > { %1082 = vst [vmem:[%s1963_s6 + $0x78] sm:$0xff] %v1065_v50 }
 0x253 PF: > { %s17_s25 = sadd.s32 1, %s1345_s25   ;;  %s1964_s21 = smov %s1333_s22 }
 0x254   : > { %p14_p12 = scmp.ge.s32.totalorder %s17_s25, 4   ;;  %s1965_s22 = smov %s1418_s29 }
 0x255   : > { %s1966_s23 = smov %s1341_s24  ;;  %s1967_s24 = smov %s1969_s26 }
 0x256   :  { %16 = sbr.rel (!%p14_p12) target bundleno = 3 (0x3), region = 121 }

</bundles_post_ra>
